<compile_context>
chip_gen: v7x
topology: tpu7x:2x2x1
jax: 0.10.0
libtpu: 0.0.40
codegen_flags: <defaults>
</compile_context>

<pallas_src>
import math

import jax
import jax.numpy as jnp
import numpy as np
from jax import lax
from jax.experimental import pallas as pl
from jax.experimental.pallas import tpu as pltpu


# ----------------------------------------------------------------------------
# Single fused kernel.
#   h1   = relu(s @ W1 + b1)                                  (B, E)
#   h2   = relu(h1 @ W2 + b2)                                 (B, E+1)
#          (last column of W2 is zero with bias 1 -> constant ones feature)
#   Wgen = zaug @ Wwpack + Bwfull                             (K*A, E+1)
#          (row k*A+a = scaled generated head weights; last col = head bias)
#   q[b, k*A+a] = sum_e h2[b, e] * Wgen[k*A+a, e]             (B, K*A)
# ----------------------------------------------------------------------------
def hyperdqn_fused_kernel(s_ref, zaug_ref, w1_ref, b1_ref, w2_ref, b2_ref,
                          wwp_ref, bwf_ref, q_ref):
    h1 = jnp.dot(s_ref[...], w1_ref[...],
                 preferred_element_type=jnp.float32) + b1_ref[...]
    h1 = jnp.maximum(h1, 0.0)

    h2 = jnp.dot(h1, w2_ref[...],
                 preferred_element_type=jnp.float32) + b2_ref[...]
    h2 = jnp.maximum(h2, 0.0)                       # (B, E+1), last col == 1

    # per-(k, a) generated head rows; posterior/prior scales and the generated
    # head bias are already folded into wwp/bwf by the host-side packing.
    wgen = jnp.dot(zaug_ref[...], wwp_ref[...],
                   preferred_element_type=jnp.float32) + bwf_ref[...]  # (K*A, E+1)

    # transposed-B contraction — MXU-native, no materialized transpose.
    q_ref[...] = lax.dot_general(
        h2, wgen, dimension_numbers=(((1,), (1,)), ((), ())),
        preferred_element_type=jnp.float32)


# ----------------------------------------------------------------------------
# Host-side parameter packing (z-independent; run once per parameter update).
# `models` is a sequence of (params_dict, scale); 1 entry for prior/posterior
# mode, 2 entries (posterior, prior) for "all" mode.
# ----------------------------------------------------------------------------
def pack_hyperdqn_params(models):
    p0, _ = models[0]
    S, H = p0["w1"].shape
    H = p0["w2"].shape[1]
    Z = p0["ww"].shape[0]
    A = p0["wb"].shape[1]
    n = len(models)
    E = n * H

    # layer 1: concat along out_features
    w1c = jnp.concatenate([p["w1"] for p, _ in models], axis=1)          # (S, E)
    b1c = jnp.concatenate([p["b1"] for p, _ in models], axis=1)          # (1, E)

    # layer 2: block-diagonal, plus one extra all-zero column whose bias is 1
    # -> constant "ones" feature that carries the generated head bias.
    blocks = []
    for i, (p, _) in enumerate(models):
        row = [jnp.zeros((H, H), jnp.float32) for _ in range(n)]
        row[i] = p["w2"]
        blocks.append(jnp.concatenate(row, axis=1))
    w2c = jnp.concatenate(blocks, axis=0)                                # (E, E)
    w2c = jnp.concatenate([w2c, jnp.zeros((E, 1), jnp.float32)], axis=1)  # (E, E+1)
    b2c = jnp.concatenate([p["b2"] for p, _ in models]
                          + [jnp.ones((1, 1), jnp.float32)], axis=1)     # (1, E+1)

    # hyper head packing: Wgen[k*A + a, :] = zaug[k*A + a] @ wwpack + bwrow[a]
    #   columns [0, E)  : scaled generated weight rows (posterior | prior)
    #   column  E       : scaled generated head bias
    w_cols = jnp.concatenate(
        [s * p["ww"].reshape(Z, A, H) for p, s in models], axis=-1)      # (Z, A, E)
    wb_col = sum(s * p["wb"] for p, s in models)                         # (Z, A)
    w_full = jnp.concatenate([w_cols, wb_col[:, :, None]], axis=-1)      # (Z, A, E+1)
    wwpack = jnp.transpose(w_full, (1, 0, 2)).reshape(A * Z, E + 1)      # rows a*Z+zi

    b_cols = jnp.concatenate(
        [s * p["bw"].reshape(A, H) for p, s in models], axis=-1)         # (A, E)
    bb_col = sum(s * p["bb"] for p, s in models).reshape(A, 1)           # (A, 1)
    bwrow = jnp.concatenate([b_cols, bb_col], axis=-1)                   # (A, E+1)

    return dict(w1=w1c, b1=b1c, w2=w2c, b2=b2c, wwpack=wwpack, bwrow=bwrow,
                S=S, H=H, Z=Z, A=A, E=E)


def _full_specs(arrays):
    # whole-array blocks (block == full dims, so the (8,128) rule is waived)
    return [pl.BlockSpec(a.shape, lambda i, nd=a.ndim: (0,) * nd) for a in arrays]


def hyperdqn_packed_forward(s, z, packed):
    """Fused forward with pre-packed parameters -> q of shape (B, K, A)."""
    B = s.shape[0]
    K, Z = z.shape
    A, E = packed["A"], packed["E"]

    # block-structured z so the generated head comes out directly as
    # (K*A, E+1) from one matmul (no in-kernel reshape needed):
    #   zaug[k*A + a, a'*Z + zi] = (a == a') * z[k, zi]
    eye_a = jnp.eye(A, dtype=jnp.float32)
    zaug = (eye_a[None, :, :, None] * z[:, None, None, :]).reshape(K * A, A * Z)
    bwfull = jnp.tile(packed["bwrow"], (K, 1))                           # (K*A, E+1)

    args = (s, zaug, packed["w1"], packed["b1"], packed["w2"], packed["b2"],
            packed["wwpack"], bwfull)

    # TODO(synk): at toy sizes the (B, K*A) output is < 128 lanes (masked
    # stores) and grid=(1,) cannot use v7x's second TensorCore; at real sizes
    # tile over B/K with a "parallel" leading axis and pad K*A to 128.
    q_flat = pl.pallas_call(
        hyperdqn_fused_kernel,
        out_shape=jax.ShapeDtypeStruct((B, K * A), jnp.float32),
        grid=(1,),
        in_specs=_full_specs(args),
        out_specs=pl.BlockSpec((B, K * A), lambda i: (0, 0)),
        compiler_params=pltpu.CompilerParams(dimension_semantics=("arbitrary",)),
    )(*args)

    return q_flat.reshape(B, K, A)


def hyperdqn_forward(s, z, params, prior_params,
                     prior_scale, posterior_scale, model="all"):
    """Pallas implementation of HyperDQN.forward (returns q_value)."""
    if model == "all":
        packed = pack_hyperdqn_params([(params, posterior_scale),
                                       (prior_params, prior_scale)])
    elif model == "posterior":
        packed = pack_hyperdqn_params([(params, posterior_scale)])
    elif model == "prior":
        packed = pack_hyperdqn_params([(prior_params, prior_scale)])
    else:
        raise ValueError(model)
    q_value = hyperdqn_packed_forward(s, z, packed)
    if z.shape[0] == 1:
        q_value = q_value[:, 0, :]
    return q_value


# ----------------------------------------------------------------------------
# Deterministic parameter construction (mirrors the module's __init__ shapes).
# Weights are stored pre-transposed as (in_features, out_features).
# ----------------------------------------------------------------------------
def init_base_params(key, S, A, Z, H1, H2):
    ks = jax.random.split(key, 4)

    def trunc(k, shape, std):
        return std * jax.random.truncated_normal(k, -2.0, 2.0, shape, jnp.float32)

    # LinearNet (tf init): trunc_normal(std=1/sqrt(fan_in)), zero bias.
    w1 = trunc(ks[0], (S, H1), 1.0 / math.sqrt(S))
    b1 = jnp.zeros((1, H1), jnp.float32)
    w2 = trunc(ks[1], (H1, H2), 1.0 / math.sqrt(H1))
    b2 = jnp.zeros((1, H2), jnp.float32)
    # HyperLinearWeight (tf init): trunc_normal(std=1/sqrt(H2)); stored (Z, A*H2),
    # columns a-major (a*H2 + h), matching the PyTorch flatten order.
    ww = trunc(ks[2], (Z, A * H2), 1.0 / math.sqrt(H2))
    bw = jnp.zeros((1, A * H2), jnp.float32)
    # HyperLinearBias: tf init is all-zeros; use small deterministic values so
    # the bias path is numerically exercised (synthetic weights, not a checkpoint).
    wb = 0.01 * jax.random.normal(ks[3], (Z, A), jnp.float32)
    bb = jnp.zeros((1, A), jnp.float32)
    return dict(w1=w1, b1=b1, w2=w2, b2=b2, ww=ww, bw=bw, wb=wb, bb=bb)


# Pure-JAX reference of HyperDQNBase.forward for validation.
def ref_base(s, z, p):
    h = jnp.maximum(s @ p["w1"] + p["b1"], 0.0)
    h = jnp.maximum(h @ p["w2"] + p["b2"], 0.0)
    K = z.shape[0]
    A = p["wb"].shape[1]
    H = p["w2"].shape[1]
    wk = (z @ p["ww"] + p["bw"]).reshape(K, A, H)
    bk = z @ p["wb"] + p["bb"]
    return jnp.einsum("bh,kah->bka", h, wk) + bk[None, :, :]


if __name__ == "__main__":
    # Small deepsea-like sizes: state=(16,), actions=4, z_size=32, hidden=(64,64)
    B, S, A, Z, H = 8, 16, 4, 32, 64
    K = 4  # number of z samples

    key = jax.random.PRNGKey(0)
    k_s, k_z, k_post, k_prior = jax.random.split(key, 4)

    s = jax.random.normal(k_s, (B, S), jnp.float32)
    z = jax.random.normal(k_z, (K, Z), jnp.float32)
    z = z / jnp.linalg.norm(z, axis=1, keepdims=True)  # generate_z normalization

    params = init_base_params(k_post, S, A, Z, H, H)
    prior_params = init_base_params(k_prior, S, A, Z, H, H)
    posterior_scale, prior_scale = 1.0, 0.5

    # model == "all": one fused kernel computes posterior + prior combined.
    q = hyperdqn_forward(s, z, params, prior_params, prior_scale, posterior_scale,
                         model="all")
    q = jax.block_until_ready(q)
    assert q.shape == (B, K, A)
    q_ref = (ref_base(s, z, params) * posterior_scale
             + ref_base(s, z, prior_params) * prior_scale)
    assert np.allclose(np.asarray(q), np.asarray(q_ref), rtol=1e-3, atol=1e-3), \
        "Pallas 'all' result does not match JAX reference"

    # single-model paths (same kernel, half-width feature dim).
    q_post = jax.block_until_ready(
        hyperdqn_forward(s, z, params, prior_params, prior_scale, posterior_scale,
                         model="posterior"))
    assert np.allclose(np.asarray(q_post),
                       np.asarray(ref_base(s, z, params) * posterior_scale),
                       rtol=1e-3, atol=1e-3), "posterior mismatch"

    q_prior = jax.block_until_ready(
        hyperdqn_forward(s, z, params, prior_params, prior_scale, posterior_scale,
                         model="prior"))
    assert np.allclose(np.asarray(q_prior),
                       np.asarray(ref_base(s, z, prior_params) * prior_scale),
                       rtol=1e-3, atol=1e-3), "prior mismatch"

    print("KERNEL_OK")
</pallas_src>

<mosaic_0001>
module attributes {stable_mosaic.version = 11 : i64} {
  func.func @hyperdqn_fused_kernel(%arg0: i32, %arg1: memref<8x16xf32, #tpu.memory_space<vmem>>, %arg2: memref<16x128xf32, #tpu.memory_space<vmem>>, %arg3: memref<16x128xf32, #tpu.memory_space<vmem>>, %arg4: memref<1x128xf32, #tpu.memory_space<vmem>>, %arg5: memref<128x129xf32, #tpu.memory_space<vmem>>, %arg6: memref<1x129xf32, #tpu.memory_space<vmem>>, %arg7: memref<128x129xf32, #tpu.memory_space<vmem>>, %arg8: memref<16x129xf32, #tpu.memory_space<vmem>>, %arg9: memref<8x16xf32, #tpu.memory_space<vmem>>) attributes {dimension_semantics = [#tpu.dimension_semantics<arbitrary>], iteration_bounds = array<i64: 1>, scalar_prefetch = 0 : i64, scratch_operands = 0 : i64, tpu.core_type = #tpu.core_type<tc>, window_params = [{pipeline_mode = #tpu.pipeline_mode<synchronous>, transform_indices = @transform_0, window_bounds = array<i64: 8, 16>}, {pipeline_mode = #tpu.pipeline_mode<synchronous>, transform_indices = @transform_1, window_bounds = array<i64: 16, 128>}, {pipeline_mode = #tpu.pipeline_mode<synchronous>, transform_indices = @transform_2, window_bounds = array<i64: 16, 128>}, {pipeline_mode = #tpu.pipeline_mode<synchronous>, transform_indices = @transform_3, window_bounds = array<i64: 1, 128>}, {pipeline_mode = #tpu.pipeline_mode<synchronous>, transform_indices = @transform_4, window_bounds = array<i64: 128, 129>}, {pipeline_mode = #tpu.pipeline_mode<synchronous>, transform_indices = @transform_5, window_bounds = array<i64: 1, 129>}, {pipeline_mode = #tpu.pipeline_mode<synchronous>, transform_indices = @transform_6, window_bounds = array<i64: 128, 129>}, {pipeline_mode = #tpu.pipeline_mode<synchronous>, transform_indices = @transform_7, window_bounds = array<i64: 16, 129>}, {pipeline_mode = #tpu.pipeline_mode<synchronous>, transform_indices = @transform_8, window_bounds = array<i64: 8, 16>}]} {
    %c0 = arith.constant 0 : index
    %c0_0 = arith.constant 0 : index
    %0 = vector.load %arg1[%c0, %c0_0] : memref<8x16xf32, #tpu.memory_space<vmem>>, vector<8x16xf32>
    %c0_1 = arith.constant 0 : index
    %c0_2 = arith.constant 0 : index
    %1 = vector.load %arg3[%c0_1, %c0_2] : memref<16x128xf32, #tpu.memory_space<vmem>>, vector<16x128xf32>
    %cst = arith.constant dense<0.000000e+00> : vector<8x128xf32>
    %2 = tpu.matmul %0, %1, %cst {dimension_numbers = #tpu.dot_dimension_numbers<[1], [0], [0], [1], [0, 0, 1, 1], [], []>} : vector<8x16xf32>, vector<16x128xf32>, vector<8x128xf32> -> vector<8x128xf32>
    %c0_3 = arith.constant 0 : index
    %c0_4 = arith.constant 0 : index
    %3 = vector.load %arg4[%c0_3, %c0_4] : memref<1x128xf32, #tpu.memory_space<vmem>>, vector<1x128xf32>
    %4 = vector.broadcast %3 : vector<1x128xf32> to vector<8x128xf32>
    %5 = arith.addf %2, %4 : vector<8x128xf32>
    %cst_5 = arith.constant 0.000000e+00 : f32
    %6 = vector.broadcast %cst_5 : f32 to vector<8x128xf32>
    %7 = arith.maximumf %5, %6 : vector<8x128xf32>
    %c0_6 = arith.constant 0 : index
    %c0_7 = arith.constant 0 : index
    %8 = vector.load %arg5[%c0_6, %c0_7] : memref<128x129xf32, #tpu.memory_space<vmem>>, vector<128x129xf32>
    %cst_8 = arith.constant dense<0.000000e+00> : vector<8x129xf32>
    %9 = tpu.matmul %7, %8, %cst_8 {dimension_numbers = #tpu.dot_dimension_numbers<[1], [0], [0], [1], [0, 0, 1, 1], [], []>} : vector<8x128xf32>, vector<128x129xf32>, vector<8x129xf32> -> vector<8x129xf32>
    %c0_9 = arith.constant 0 : index
    %c0_10 = arith.constant 0 : index
    %10 = vector.load %arg6[%c0_9, %c0_10] : memref<1x129xf32, #tpu.memory_space<vmem>>, vector<1x129xf32>
    %11 = vector.broadcast %10 : vector<1x129xf32> to vector<8x129xf32>
    %12 = arith.addf %9, %11 : vector<8x129xf32>
    %cst_11 = arith.constant 0.000000e+00 : f32
    %13 = vector.broadcast %cst_11 : f32 to vector<8x129xf32>
    %14 = arith.maximumf %12, %13 : vector<8x129xf32>
    %c0_12 = arith.constant 0 : index
    %c0_13 = arith.constant 0 : index
    %15 = vector.load %arg2[%c0_12, %c0_13] : memref<16x128xf32, #tpu.memory_space<vmem>>, vector<16x128xf32>
    %c0_14 = arith.constant 0 : index
    %c0_15 = arith.constant 0 : index
    %16 = vector.load %arg7[%c0_14, %c0_15] : memref<128x129xf32, #tpu.memory_space<vmem>>, vector<128x129xf32>
    %cst_16 = arith.constant dense<0.000000e+00> : vector<16x129xf32>
    %17 = tpu.matmul %15, %16, %cst_16 {dimension_numbers = #tpu.dot_dimension_numbers<[1], [0], [0], [1], [0, 0, 1, 1], [], []>} : vector<16x128xf32>, vector<128x129xf32>, vector<16x129xf32> -> vector<16x129xf32>
    %c0_17 = arith.constant 0 : index
    %c0_18 = arith.constant 0 : index
    %18 = vector.load %arg8[%c0_17, %c0_18] : memref<16x129xf32, #tpu.memory_space<vmem>>, vector<16x129xf32>
    %19 = arith.addf %17, %18 : vector<16x129xf32>
    %cst_19 = arith.constant dense<0.000000e+00> : vector<8x16xf32>
    %20 = tpu.matmul %14, %19, %cst_19 {dimension_numbers = #tpu.dot_dimension_numbers<[1], [1], [0], [0], [0, 0, 1, 0], [], []>} : vector<8x129xf32>, vector<16x129xf32>, vector<8x16xf32> -> vector<8x16xf32>
    %c0_20 = arith.constant 0 : index
    %c0_21 = arith.constant 0 : index
    %21 = vector.load %arg9[%c0_20, %c0_21] : memref<8x16xf32, #tpu.memory_space<vmem>>, vector<8x16xf32>
    tpu.vector_store %arg9[%c0_20, %c0_21], %20 {strides = array<i32>} : memref<8x16xf32, #tpu.memory_space<vmem>>, vector<8x16xf32>,
    return
  }
  func.func @transform_0(%arg0: i32) -> (i32, i32) {
    %c0_i32 = arith.constant 0 : i32
    %c0_i32_0 = arith.constant 0 : i32
    %c0_i32_1 = arith.constant 0 : i32
    return %c0_i32, %c0_i32_0 : i32, i32
  }
  func.func @transform_1(%arg0: i32) -> (i32, i32) {
    %c0_i32 = arith.constant 0 : i32
    %c0_i32_0 = arith.constant 0 : i32
    %c0_i32_1 = arith.constant 0 : i32
    return %c0_i32, %c0_i32_0 : i32, i32
  }
  func.func @transform_2(%arg0: i32) -> (i32, i32) {
    %c0_i32 = arith.constant 0 : i32
    %c0_i32_0 = arith.constant 0 : i32
    %c0_i32_1 = arith.constant 0 : i32
    return %c0_i32, %c0_i32_0 : i32, i32
  }
  func.func @transform_3(%arg0: i32) -> (i32, i32) {
    %c0_i32 = arith.constant 0 : i32
    %c0_i32_0 = arith.constant 0 : i32
    %c0_i32_1 = arith.constant 0 : i32
    return %c0_i32, %c0_i32_0 : i32, i32
  }
  func.func @transform_4(%arg0: i32) -> (i32, i32) {
    %c0_i32 = arith.constant 0 : i32
    %c0_i32_0 = arith.constant 0 : i32
    %c0_i32_1 = arith.constant 0 : i32
    return %c0_i32, %c0_i32_0 : i32, i32
  }
  func.func @transform_5(%arg0: i32) -> (i32, i32) {
    %c0_i32 = arith.constant 0 : i32
    %c0_i32_0 = arith.constant 0 : i32
    %c0_i32_1 = arith.constant 0 : i32
    return %c0_i32, %c0_i32_0 : i32, i32
  }
  func.func @transform_6(%arg0: i32) -> (i32, i32) {
    %c0_i32 = arith.constant 0 : i32
    %c0_i32_0 = arith.constant 0 : i32
    %c0_i32_1 = arith.constant 0 : i32
    return %c0_i32, %c0_i32_0 : i32, i32
  }
  func.func @transform_7(%arg0: i32) -> (i32, i32) {
    %c0_i32 = arith.constant 0 : i32
    %c0_i32_0 = arith.constant 0 : i32
    %c0_i32_1 = arith.constant 0 : i32
    return %c0_i32, %c0_i32_0 : i32, i32
  }
  func.func @transform_8(%arg0: i32) -> (i32, i32) {
    %c0_i32 = arith.constant 0 : i32
    %c0_i32_0 = arith.constant 0 : i32
    %c0_i32_1 = arith.constant 0 : i32
    return %c0_i32, %c0_i32_0 : i32, i32
  }
}

</mosaic_0001>

<bundles_post_ra>
// kernel: tpu_custom_call.1
= control target key start
LH: loop header
LB: loop body
LE: loop exit
PB: predicated region body
PF: predicated region fallthrough
CT: control target
= control target key end

     0   :  { %v557_v2 = vmov 0.0|0.0   ;;  %vm558_vm0 = vmmov 0   ;;  %v559_v4 = vmov 0.0   ;;  %vm40_vm1 = vcmask 130048   ;;  %s852_s0 = inlined_call_operand.vmem [shape: f32[8,16], index: 0, kind: input, shape index: {}]   ;;  %s853_s1 = inlined_call_operand.vmem [shape: f32[16,128], index: 1, kind: input, shape index: {}]   ;;  %s854_s2 = inlined_call_operand.vmem [shape: f32[16,128], index: 2, kind: input, shape index: {}]   ;;  %s855_s3 = inlined_call_operand.vmem [shape: f32[1,128], index: 3, kind: input, shape index: {}]   ;;  %s856_s4 = inlined_call_operand.vmem [shape: f32[128,129], index: 4, kind: input, shape index: {}]   ;;  %s857_s5 = inlined_call_operand.vmem [shape: f32[1,129], index: 5, kind: input, shape index: {}]   ;;  %s858_s6 = inlined_call_operand.vmem [shape: f32[128,129], index: 6, kind: input, shape index: {}]   ;;  %s859_s7 = inlined_call_operand.vmem [shape: f32[16,129], index: 7, kind: input, shape index: {}]   ;;  %s860_s8 = inlined_call_operand.hbm [shape: f32[8,16], index: 8, kind: output, shape index: {}]  }
   0x1   :  { %v31_v0 = vld [vmem:[%s854_s2] sm:$0xff]  ;;  %v32_v1 = vld [vmem:[%s854_s2 + $0x8] sm:$0xff]  ;;  %457 = vmatprep.subr.bf16.mxu0 %v557_v2  ;;  %454 = vmatprep.mubr.msk.f32.mxu0 %vm558_vm0, %v559_v4  ;;  %v237_v6 = vld [vmem:[%s858_s6 + $0x18] sm:$0xff] }
   0x2   :  { %v458_v3 = vpack.c.bf16 %v32_v1, %v31_v0  ;;  %v235_v5 = vld [vmem:[%s858_s6 + $0x8] sm:$0xff]  ;;  %v234_v7 = vld [vmem:[%s858_s6] sm:$0xff]  ;;  %v236_v9 = vld [vmem:[%s858_s6 + $0x10] sm:$0xff]  ;;  %223 = vmatprep.mubr.f32.mxu1 %v559_v4 }
   0x3   :  { %v492_v8 = vpack.c.bf16 %v237_v6, %v235_v5  ;;  %v239_v10 = vld [vmem:[%s858_s6 + $0x28] sm:$0xff]  ;;  %v241_v11 = vld [vmem:[%s858_s6 + $0x38] sm:$0xff]  ;;  %v30_v12 = vld [vmem:[%s852_s0] sm:$0xff]  ;;  %v494_v13 = vpack.c.bf16 %v236_v9, %v234_v7 }
   0x4   :  { %459 = vmatpush3.bf16.msra.mxu0 %v458_v3  ;;  %v496_v14 = vpack.c.bf16 %v241_v11, %v239_v10  ;;  %v238_v15 = vld [vmem:[%s858_s6 + $0x20] sm:$0xff]  ;;  %v240_v16 = vld [vmem:[%s858_s6 + $0x30] sm:$0xff]  ;;  %v243_v17 = vld [vmem:[%s858_s6 + $0x48] sm:$0xff] }
   0x5   :  { %493 = vmatprep.subr.bf16.mxu0 %v492_v8  ;;  %v245_v18 = vld [vmem:[%s858_s6 + $0x58] sm:$0xff]  ;;  %v498_v19 = vpack.c.bf16 %v240_v16, %v238_v15  ;;  %v242_v20 = vld [vmem:[%s858_s6 + $0x40] sm:$0xff]  ;;  %v116_v21 = vld [vmem:[%s856_s4 + $0x8] sm:$0xff] }
   0x6   :  { %v118_v22 = vld [vmem:[%s856_s4 + $0x18] sm:$0xff]  ;;  %v500_v23 = vpack.c.bf16 %v245_v18, %v243_v17  ;;  %v244_v24 = vld [vmem:[%s858_s6 + $0x50] sm:$0xff]  ;;  %v115_v26 = vld [vmem:[%s856_s4] sm:$0xff] }
   0x7   :  { %455 = vmatmul.mubr.msk.f32.vlgmr.msra.gmra.mrb[0].mxu0 %vm40_vm1, %v30_v12  ;;  %v460_v25 = vpack.c.bf16 %v118_v22, %v116_v21  ;;  %v117_v27 = vld [vmem:[%s856_s4 + $0x10] sm:$0xff]  ;;  %v247_v28 = vld [vmem:[%s858_s6 + $0x68] sm:$0xff]  ;;  %v249_v29 = vld [vmem:[%s858_s6 + $0x78] sm:$0xff]  ;;  %v502_v33 = vpack.c.bf16 %v244_v24, %v242_v20 }
   0x8   :  { %495 = vmatpush1.bf16.msra.mxu0 %v494_v13  ;;  %334 = vmatprep.mubr.f32.mxu0 %v559_v4  ;;  %v462_v30 = vpack.c.bf16 %v117_v27, %v115_v26  ;;  %v120_v31 = vld [vmem:[%s856_s4 + $0x28] sm:$0xff]  ;;  %v122_v32 = vld [vmem:[%s856_s4 + $0x38] sm:$0xff]  ;;  %v246_v34 = vld [vmem:[%s858_s6 + $0x60] sm:$0xff]  ;;  %v504_v38 = vpack.c.bf16 %v249_v29, %v247_v28 }
   0x9   :  { %497 = vmatprep.subr.bf16.mxu0 %v496_v14  ;;  %461 = vmatprep.subr.bf16.mxu1 %v460_v25  ;;  %v464_v35 = vpack.c.bf16 %v122_v32, %v120_v31  ;;  %v119_v36 = vld [vmem:[%s856_s4 + $0x20] sm:$0xff]  ;;  %v121_v37 = vld [vmem:[%s856_s4 + $0x30] sm:$0xff]  ;;  %v124_v41 = vld [vmem:[%s856_s4 + $0x48] sm:$0xff] }
   0xa   :  { %463 = vmatpush1.bf16.msra.mxu1 %v462_v30  ;;  %v248_v39 = vld [vmem:[%s858_s6 + $0x70] sm:$0xff]  ;;  %v466_v40 = vpack.c.bf16 %v121_v37, %v119_v36  ;;  %v126_v42 = vld [vmem:[%s856_s4 + $0x58] sm:$0xff]  ;;  %v251_v43 = vld [vmem:[%s858_s6 + $0x88] sm:$0xff] }
   0xb   :  { %v253_v44 = vld [vmem:[%s858_s6 + $0x98] sm:$0xff]  ;;  %465 = vmatprep.subr.bf16.mxu1 %v464_v35  ;;  %v468_v45 = vpack.c.bf16 %v126_v42, %v124_v41  ;;  %v123_v46 = vld [vmem:[%s856_s4 + $0x40] sm:$0xff]  ;;  %v125_v48 = vld [vmem:[%s856_s4 + $0x50] sm:$0xff]  ;;  %v506_v49 = vpack.c.bf16 %v248_v39, %v246_v34 }
   0xc   :  { %499 = vmatpush1.bf16.msra.mxu0 %v498_v19  ;;  %v250_v47 = vld [vmem:[%s858_s6 + $0x80] sm:$0xff]  ;;  %v252_v50 = vld [vmem:[%s858_s6 + $0x90] sm:$0xff]  ;;  %v470_v51 = vpack.c.bf16 %v125_v48, %v123_v46  ;;  %v128_v52 = vld [vmem:[%s856_s4 + $0x68] sm:$0xff]  ;;  %v508_v54 = vpack.c.bf16 %v253_v44, %v251_v43 }
   0xd   :  { %501 = vmatprep.subr.bf16.mxu0 %v500_v23  ;;  %v130_v53 = vld [vmem:[%s856_s4 + $0x78] sm:$0xff]  ;;  %v255_v55 = vld [vmem:[%s858_s6 + $0xa8] sm:$0xff]  ;;  %v127_v57 = vld [vmem:[%s856_s4 + $0x60] sm:$0xff]  ;;  %v510_v62 = vpack.c.bf16 %v252_v50, %v250_v47 }
   0xe   :  { %467 = vmatpush1.bf16.msra.mxu1 %v466_v40  ;;  %v472_v56 = vpack.c.bf16 %v130_v53, %v128_v52  ;;  %v129_v58 = vld [vmem:[%s856_s4 + $0x70] sm:$0xff]  ;;  %v257_v59 = vld [vmem:[%s858_s6 + $0xb8] sm:$0xff]  ;;  %v132_v60 = vld [vmem:[%s856_s4 + $0x88] sm:$0xff] }
   0xf   :  { %469 = vmatprep.subr.bf16.mxu1 %v468_v45  ;;  %v134_v61 = vld [vmem:[%s856_s4 + $0x98] sm:$0xff]  ;;  %v254_v63 = vld [vmem:[%s858_s6 + $0xa0] sm:$0xff]  ;;  %v256_v0 = vld [vmem:[%s858_s6 + $0xb0] sm:$0xff]  ;;  %v474_v1 = vpack.c.bf16 %v129_v58, %v127_v57  ;;  %v512_v2 = vpack.c.bf16 %v257_v59, %v255_v55 }
  0x10   :  { %503 = vmatpush1.bf16.msra.mxu0 %v502_v33  ;;  %v259_v3 = vld [vmem:[%s858_s6 + $0xc8] sm:$0xff]  ;;  %v476_v5 = vpack.c.bf16 %v134_v61, %v132_v60  ;;  %v131_v6 = vld [vmem:[%s856_s4 + $0x80] sm:$0xff]  ;;  %v133_v7 = vld [vmem:[%s856_s4 + $0x90] sm:$0xff] }
  0x11   :  { %505 = vmatprep.subr.bf16.mxu0 %v504_v38  ;;  %v261_v8 = vld [vmem:[%s858_s6 + $0xd8] sm:$0xff]  ;;  %v136_v9 = vld [vmem:[%s856_s4 + $0xa8] sm:$0xff] }
  0x12   :  { %471 = vmatpush1.bf16.msra.mxu1 %v470_v51  ;;  %v138_v10 = vld [vmem:[%s856_s4 + $0xb8] sm:$0xff] }
  0x13   :  { %473 = vmatprep.subr.bf16.mxu1 %v472_v56 }
  0x14   :  { %507 = vmatpush1.bf16.msra.mxu0 %v506_v49 }
  0x15   :  { %509 = vmatprep.subr.bf16.mxu0 %v508_v54 }
  0x16   :  { %13 = vsyncpa [#allocation3], 0  ;;  %v514_v11 = vpack.c.bf16 %v256_v0, %v254_v63  ;;  %v258_v12 = vld [vmem:[%s858_s6 + $0xc0] sm:$0xff]  ;;  %v260_v13 = vld [vmem:[%s858_s6 + $0xd0] sm:$0xff]  ;;  %475 = vmatpush1.bf16.msra.mxu1 %v474_v1  ;;  %v478_v14 = vpack.c.bf16 %v133_v7, %v131_v6  ;;  %v516_v15 = vpack.c.bf16 %v261_v8, %v259_v3  ;;  %v480_v17 = vpack.c.bf16 %v138_v10, %v136_v9 }
  0x17   :  { %v263_v16 = vld [vmem:[%s858_s6 + $0xe8] sm:$0xff]  ;;  %477 = vmatprep.subr.bf16.mxu1 %v476_v5  ;;  %v135_v18 = vld [vmem:[%s856_s4 + $0xa0] sm:$0xff]  ;;  %v137_v19 = vld [vmem:[%s856_s4 + $0xb0] sm:$0xff]  ;;  %v518_v23 = vpack.c.bf16 %v260_v13, %v258_v12  ;;  %vm347_vm2 = vcmask 7168   ;;  %v149_v59 = vlaneseq }
  0x18   :  { %511 = vmatpush1.bf16.msra.mxu0 %v510_v62  ;;  %v265_v20 = vld [vmem:[%s858_s6 + $0xf8] sm:$0xff]  ;;  %v140_v21 = vld [vmem:[%s856_s4 + $0xc8] sm:$0xff]  ;;  %v262_v24 = vld [vmem:[%s858_s6 + $0xe0] sm:$0xff]  ;;  %v482_v25 = vpack.c.bf16 %v137_v19, %v135_v18 }
  0x19   :  { %513 = vmatprep.subr.bf16.mxu0 %v512_v2  ;;  %v142_v22 = vld [vmem:[%s856_s4 + $0xd8] sm:$0xff]  ;;  %v520_v26 = vpack.c.bf16 %v265_v20, %v263_v16  ;;  %v264_v27 = vld [vmem:[%s858_s6 + $0xf0] sm:$0xff]  ;;  %v139_v29 = vld [vmem:[%s856_s4 + $0xc0] sm:$0xff]  ;;  %v150_v60 = vshrl.u32 %v149_v59, 7 }
  0x1a   :  { %479 = vmatpush1.bf16.msra.mxu1 %v478_v14  ;;  %v484_v28 = vpack.c.bf16 %v142_v22, %v140_v21  ;;  %v141_v30 = vld [vmem:[%s856_s4 + $0xd0] sm:$0xff]  ;;  %v522_v31 = vpack.c.bf16 %v264_v27, %v262_v24  ;;  %v232_v33 = vld [vmem:[%s853_s1] sm:$0xff]  ;;  %v233_v34 = vld [vmem:[%s853_s1 + $0x8] sm:$0xff] }
  0x1b   :  { %481 = vmatprep.subr.bf16.mxu1 %v480_v17  ;;  %v486_v32 = vpack.c.bf16 %v141_v30, %v139_v29  ;;  %v144_v35 = vld [vmem:[%s856_s4 + $0xe8] sm:$0xff]  ;;  %v146_v36 = vld [vmem:[%s856_s4 + $0xf8] sm:$0xff]  ;;  %v143_v38 = vld [vmem:[%s856_s4 + $0xe0] sm:$0xff]  ;;  %v151_v61 = vsub.s32 0, %v150_v60  ;;  %v155_v63 = vsub.s32 1, %v150_v60 }
  0x1c   :  { %515 = vmatpush1.bf16.msra.mxu0 %v514_v11  ;;  %v488_v37 = vpack.c.bf16 %v146_v36, %v144_v35  ;;  %v442_v40 = vld [vmem:[%s855_s3] ss:$0 sm:$0xff]  ;;  %v267_v47 = vld [vmem:[%s859_s7 + $0x8] sm:$0xff]  ;;  %v268_v49 = vld [vmem:[%s859_s7 + $0x10] sm:$0xff] }
  0x1d   :  { %517 = vmatprep.subr.bf16.mxu0 %v516_v15  ;;  %v266_v45 = vld [vmem:[%s859_s7] sm:$0xff]  ;;  %v269_v51 = vld [vmem:[%s859_s7 + $0x18] sm:$0xff]  ;;  %vm525_vm3 = vmpackc.low %vm347_vm2, %vm347_vm2  ;;  %s560_s7 = smov [#allocation2]  }
  0x1e   :  { %483 = vmatpush1.bf16.msra.mxu1 %v482_v25  ;;  %v147_v62 = vld [vmem:[%s857_s5] sm:$0x3]  ;;  %s434_s0 = sshll.u32 %s560_s7, 4  ;;  %s435_s0 = int_to_ptr.vmem [resolvable:$true] %s434_s0 }
  0x1f   :  { %485 = vmatprep.subr.bf16.mxu1 %v484_v28  ;;  %v152_v0 = vrot.slane %v147_v62, %v151_v61  ;;  %v156_v1 = vrot.slane %v147_v62, %v155_v63  ;;  %s533_s5 = scalar_lea.vmem %s435_s0, 128  ;;  %p538_p1 = scmp.lt.s32.totalorder %s435_s0, %s435_s0 }
  0x20   :  { %519 = vmatpush1.bf16.msra.mxu0 %v518_v23  ;;  %p534_p0 = scmp.ne.s32.totalorder %s435_s0, %s533_s5  ;;  %p539_p2 = scmp.lt.s32.totalorder %s533_s5, %s533_s5 }
  0x21   :  { %521 = vmatprep.subr.bf16.mxu0 %v520_v26 }
  0x22   :  { %487 = vmatpush1.bf16.msra.mxu1 %v486_v32  ;;  %p540_p3 = por %p539_p2, %p538_p1 }
  0x23   :  { %489 = vmatprep.subr.bf16.mxu1 %v488_v37 }
  0x24   :  { %523 = vmatpush1.bf16.msra.mxu0 %v522_v31  ;;  %p541_p4 = pnand %p540_p3, %p534_p0 }
  0x27   :  { %335 = vmatmul.mubr.f32.vlgmr.msra.gmra.mrb[2].mxu0 %v232_v33 }
  0x28   :  { %340 = vmatprep.mubr.f32.mxu0 %v559_v4  ;;  %v145_v4 = vld [vmem:[%s856_s4 + $0xf0] sm:$0xff] }
  0x29   :  { %v490_v39 = vpack.c.bf16 %v145_v4, %v143_v38 }
  0x2b   :  { %341 = vmatmul.mubr.f32.gmra.mrb[4].mxu0 %v233_v34  ;;  %491 = vmatpush1.bf16.msra.mxu1 %v490_v39 }
  0xda   :  { %v110_v41 = vpop.f32.mrb[0].mxu0 }
  0xdb   :  { %v111_v42 = vadd.f32 %v442_v40, %v110_v41  ;;  %v456_v43 = vpop.f32.mrb[1].mxu0 }
  0xdd   :  { %v114_v44 = vmax.f32 %v111_v42, 0.0 }
  0xdf   :  { %224 = vmatmul.mubr.f32.vlgmr.msra.gmra.mrb[0].mxu1 %v114_v44 }
  0xfa   :  { %v336_v46 = vpop.f32.mrb[2].mxu0 }
  0xfb   :  { %v338_v48 = vpop.f32.mrb[3].mxu0  ;;  %v337_v50 = vadd.f32 %v336_v46, %v266_v45 }
  0xfc   :  { %v339_v52 = vadd.f32 %v338_v48, %v267_v47 }
  0xfe   :  { %v342_v53 = vpop.f32.mrb[4].mxu0 }
  0xff   :  { %v343_v54 = vadd.f32 %v342_v53, %v268_v49  ;;  %v344_v55 = vpop.f32.mrb[5].mxu0 }
 0x100   :  { %v345_v56 = vadd.f32 %v344_v55, %v269_v51 }
 0x101   :  { %v527_v57 = vpack.c.bf16 %v343_v54, %v337_v50 }
 0x102   :  { %v524_v58 = vpack.c.bf16 %v345_v56, %v339_v52 }
 0x104   :  { %526 = vmatprep.subr.msk.bf16.mxu1 %vm525_vm3, %v524_v58 }
 0x105   :  { %528 = vmatpush1.bf16.xpose.msra.mxu1 %v527_v57 }
 0x1b2   :  { %v225_v2 = vpop.f32.mrb[0].mxu1 }
 0x1b3   :  { %v226_v3 = vadd.f32 %v225_v2, %v152_v0  ;;  %v227_v5 = vpop.f32.mrb[1].mxu1 }
 0x1b4   :  { %v228_v6 = vadd.f32 %v227_v5, %v156_v1 }
 0x1b5   :  { %v230_v8 = vmax.f32 %v226_v3, 0.0 }
 0x1b6   :  { %v231_v7 = vmax.f32 %v228_v6, 0.0 }
 0x1b8   :  { %446 = vmatprep.mubr.msk.f32.mxu1 %vm347_vm2, %v231_v7 }
 0x1b9   :  { %422 = vmatmul.mubr.f32.vlgmr.msra.gmra.mrb[2].mxu1 %v230_v8 }
 0x28c   :  { %v423_v9 = vpop.f32.mrb[2].mxu1 }
 0x28d   :  { %427 = vst.msk [vmem:[#allocation2] sm:$0xff] %vm40_vm1, %v423_v9  ;;  %v425_v10 = vpop.f32.mrb[3].mxu1 }
 0x28e   :  { %544 = shalt.err (!%p541_p4)
}
 0x28f   :  { %s545_s10 = scalar_lea.hbm %s860_s8, 128 }
 0x290   :  { %p546_p5 = scmp.ne.s32.totalorder %s860_s8, %s545_s10  ;;  %p549_p6 = scmp.lt.u32.totalorder %s545_s10, %s860_s8 }
 0x292   :  { %p551_p7 = pnand %p549_p6, %p546_p5 }
 0x294   :  { %554 = shalt.err (!%p551_p7)
}
 0x295   :  { %437 = dma.vmem_to_hbm [thread:$0]  %s435_s0, 128, %s860_s8, [#allocation3]  }
 0x296   :  { %555 = dma.done.wait [#allocation3], 128  }
 0x297   :  { %556 = vsyncadd [#allocation3], 4294967168 }
 0x298   :  { %441 = vsyncpa [#allocation3], 1 }

</bundles_post_ra>
